<compile_context>
chip_gen: v5e
topology: v5e:2x2
jax: 0.10.0
libtpu: 0.0.40
codegen_flags: <defaults>
</compile_context>

<pallas_src>
import math

import jax
import jax.numpy as jnp
from jax.experimental import pallas as pl
from jax.experimental.pallas import tpu as pltpu

LOG2 = math.log(2.0)


def _cdiv(a, b):
    return -(-a // b)


def _round_up(x, m):
    return ((x + m - 1) // m) * m


# ---------------------------------------------------------------------------
# Kernel: fused lin1 -> softplus -> lin2 -> residual over a tile of nodes.
# ---------------------------------------------------------------------------
def _update_v_kernel(agg_ref, v_ref, w1_ref, b1_ref, w2_ref, b2_ref, o_ref):
    # lin1: (tile, F) bf16 @ (F, H) bf16 -> f32 accumulator on the MXU.
    h = jnp.dot(agg_ref[...], w1_ref[...], preferred_element_type=jnp.float32)
    h = h + b1_ref[...]
    # Numerically stable softplus in f32 (the "- log 2" shift is folded into b2).
    h = jnp.maximum(h, 0.0) + jnp.log1p(jnp.exp(-jnp.abs(h)))
    # TODO(synk): dropout is identity here (eval semantics); training mode would
    # use pltpu.prng_seed + pltpu.stateful_bernoulli on h.
    # lin2: (tile, H) bf16 @ (H, H) bf16 -> f32 accumulator.
    out = jnp.dot(h.astype(w2_ref.dtype), w2_ref[...],
                  preferred_element_type=jnp.float32)
    out = out + b2_ref[...]
    # Residual connection in f32, cast once on store.
    o_ref[...] = (v_ref[...].astype(jnp.float32) + out).astype(o_ref.dtype)


# ---------------------------------------------------------------------------
# Wrapper
# ---------------------------------------------------------------------------
def update_v_forward(v, e, edge_index, kparams, *, tile_n=1024, out_dtype=None):
    N, H = v.shape
    F_ = e.shape[1]
    out_dtype = out_dtype or v.dtype
    stream_dtype = kparams["w1"].dtype

    # --- glue: scatter-add edge features onto target nodes i ----------------
    # Data-dependent scatter has no clean dense Pallas tiling; the node-level
    # (N, F) output is tiny vs. the edge set, so the HBM round-trip is cheap.
    # TODO(synk): for very high edge/node ratios, fuse the scatter into the
    # kernel via sorted edges + PrefetchScalarGridSpec(num_scalar_prefetch=1).
    i = edge_index[1]
    agg = jax.ops.segment_sum(e, i, num_segments=N)

    # bf16 streams (in a full model these casts fuse into the producers).
    agg = agg.astype(stream_dtype)
    v_s = v.astype(stream_dtype)

    # --- node tile: multiple of 16 sublanes (bf16 packing), large enough to
    # amortize per-step pipeline overhead, small enough that large N yields
    # many grid programs so the "parallel" axis keeps both v7x cores fed.
    tile = min(tile_n, max(16, _round_up(_cdiv(N, 8), 16)))
    grid = (pl.cdiv(N, tile),)

    out = pl.pallas_call(
        _update_v_kernel,
        out_shape=jax.ShapeDtypeStruct((N, H), out_dtype),
        grid_spec=pltpu.PrefetchScalarGridSpec(
            num_scalar_prefetch=0,
            grid=grid,
            in_specs=[
                pl.BlockSpec((tile, F_), lambda n: (n, 0)),   # agg (bf16 stream)
                pl.BlockSpec((tile, H), lambda n: (n, 0)),    # v residual (bf16 stream)
                # Constant-index weight/bias tiles: DMA'd once, reused each step.
                # TODO(synk): on v7x with large H, pipeline_mode=pl.Buffered(1)
                # on these four specs removes the redundant second buffer.
                pl.BlockSpec((F_, H), lambda n: (0, 0)),      # w1 (bf16)
                pl.BlockSpec((1, H), lambda n: (0, 0)),       # b1 (f32)
                pl.BlockSpec((H, H), lambda n: (0, 0)),       # w2 (bf16)
                pl.BlockSpec((1, H), lambda n: (0, 0)),       # b2 (f32, shift folded)
            ],
            out_specs=pl.BlockSpec((tile, H), lambda n: (n, 0)),
        ),
        compiler_params=pltpu.CompilerParams(
            dimension_semantics=("parallel",),
            # Ample for these tiles on every generation (v7x physical VMEM is
            # 64 MiB; v5e/v6e can raise this further before shrinking tiles).
            vmem_limit_bytes=32 * 1024 * 1024,
        ),
    )(agg, v_s, kparams["w1"], kparams["b1"], kparams["w2"], kparams["b2"])
    return out


# ---------------------------------------------------------------------------
# Parameter init (matches the PyTorch reset_parameters) + one-time kernel prep.
# ---------------------------------------------------------------------------
def _xavier_uniform(key, fan_in, fan_out):
    bound = math.sqrt(6.0 / (fan_in + fan_out))
    # stored as (in, out) so the kernel computes x @ W directly
    return jax.random.uniform(key, (fan_in, fan_out), jnp.float32,
                              minval=-bound, maxval=bound)


def init_params(key, hidden_channels, num_filters):
    k1, k2 = jax.random.split(key, 2)
    return {
        "w1": _xavier_uniform(k1, num_filters, hidden_channels),
        "b1": jnp.zeros((hidden_channels,), jnp.float32),
        "w2": _xavier_uniform(k2, hidden_channels, hidden_channels),
        "b2": jnp.zeros((hidden_channels,), jnp.float32),
    }


def prepare_params(params, *, weight_dtype=jnp.bfloat16):
    """One-time prep: bf16 weights + ShiftedSoftplus shift folded into b2.

    (softplus(h) - log2) @ w2 + b2 == softplus(h) @ w2 + (b2 - log2 * sum_k w2[k, :])
    """
    w1 = params["w1"].astype(weight_dtype)
    w2 = params["w2"].astype(weight_dtype)
    b2_eff = params["b2"] - LOG2 * jnp.sum(w2.astype(jnp.float32), axis=0)
    return {
        "w1": w1,
        "b1": params["b1"].reshape(1, -1).astype(jnp.float32),
        "w2": w2,
        "b2": b2_eff.reshape(1, -1).astype(jnp.float32),
    }


# ---------------------------------------------------------------------------
# References
# ---------------------------------------------------------------------------
def _reference_f32(v, e, edge_index, params):
    """Full-f32 module semantics (ground truth)."""
    agg = jax.ops.segment_sum(e, edge_index[1], num_segments=v.shape[0])
    h = agg @ params["w1"] + params["b1"]
    h = jax.nn.softplus(h) - LOG2
    return v + h @ params["w2"] + params["b2"]


def _reference_matched(v, e, edge_index, kparams):
    """Same math as the kernel (bf16 streams/weights, f32 accum) in plain JAX."""
    agg = jax.ops.segment_sum(e, edge_index[1], num_segments=v.shape[0])
    agg = agg.astype(kparams["w1"].dtype)
    h = jnp.dot(agg, kparams["w1"], preferred_element_type=jnp.float32) + kparams["b1"]
    h = jax.nn.softplus(h)
    out = jnp.dot(h.astype(kparams["w2"].dtype), kparams["w2"],
                  preferred_element_type=jnp.float32) + kparams["b2"]
    return v.astype(kparams["w1"].dtype).astype(jnp.float32) + out


if __name__ == "__main__":
    hidden_channels = 32
    num_filters = 16
    num_nodes = 16
    num_edges = 64

    key = jax.random.PRNGKey(0)
    kv, ke, ki, kp = jax.random.split(key, 4)

    v = jax.random.normal(kv, (num_nodes, hidden_channels), jnp.float32)
    e = jax.random.normal(ke, (num_edges, num_filters), jnp.float32)
    edge_index = jax.random.randint(ki, (2, num_edges), 0, num_nodes,
                                    dtype=jnp.int32)

    params = init_params(kp, hidden_channels, num_filters)
    kparams = prepare_params(params)          # one-time, not per forward

    out = update_v_forward(v, e, edge_index, kparams)
    out = jax.block_until_ready(out)

    assert out.shape == (num_nodes, hidden_channels)
    assert out.dtype == v.dtype

    # Tight check vs. an identically-quantized plain-JAX reference (kernel math).
    ref_m = _reference_matched(v, e, edge_index, kparams)
    assert jnp.allclose(out.astype(jnp.float32), ref_m, rtol=2e-3, atol=2e-3)

    # Loose sanity check vs. full-f32 module semantics (bf16 stream/weight error).
    ref_f = _reference_f32(v, e, edge_index, params)
    assert jnp.allclose(out.astype(jnp.float32), ref_f, rtol=5e-2, atol=5e-2)

    print("KERNEL_OK")
</pallas_src>

<mosaic_0001>
module attributes {stable_mosaic.version = 11 : i64} {
  func.func @_update_v_kernel(%arg0: i32, %arg1: memref<16x16xbf16, #tpu.memory_space<vmem>>, %arg2: memref<16x32xbf16, #tpu.memory_space<vmem>>, %arg3: memref<16x32xbf16, #tpu.memory_space<vmem>>, %arg4: memref<1x32xf32, #tpu.memory_space<vmem>>, %arg5: memref<32x32xbf16, #tpu.memory_space<vmem>>, %arg6: memref<1x32xf32, #tpu.memory_space<vmem>>, %arg7: memref<16x32xf32, #tpu.memory_space<vmem>>) attributes {dimension_semantics = [#tpu.dimension_semantics<parallel>], iteration_bounds = array<i64: 1>, scalar_prefetch = 0 : i64, scratch_operands = 0 : i64, tpu.core_type = #tpu.core_type<tc>, window_params = [{transform_indices = @transform_0, window_bounds = array<i64: 16, 16>}, {transform_indices = @transform_1, window_bounds = array<i64: 16, 32>}, {pipeline_mode = #tpu.pipeline_mode<synchronous>, transform_indices = @transform_2, window_bounds = array<i64: 16, 32>}, {pipeline_mode = #tpu.pipeline_mode<synchronous>, transform_indices = @transform_3, window_bounds = array<i64: 1, 32>}, {pipeline_mode = #tpu.pipeline_mode<synchronous>, transform_indices = @transform_4, window_bounds = array<i64: 32, 32>}, {pipeline_mode = #tpu.pipeline_mode<synchronous>, transform_indices = @transform_5, window_bounds = array<i64: 1, 32>}, {transform_indices = @transform_6, window_bounds = array<i64: 16, 32>}]} {
    %c0 = arith.constant 0 : index
    %c0_0 = arith.constant 0 : index
    %0 = vector.load %arg1[%c0, %c0_0] : memref<16x16xbf16, #tpu.memory_space<vmem>>, vector<16x16xbf16>
    %c0_1 = arith.constant 0 : index
    %c0_2 = arith.constant 0 : index
    %1 = vector.load %arg3[%c0_1, %c0_2] : memref<16x32xbf16, #tpu.memory_space<vmem>>, vector<16x32xbf16>
    %cst = arith.constant dense<0.000000e+00> : vector<16x32xf32>
    %2 = tpu.matmul %0, %1, %cst {dimension_numbers = #tpu.dot_dimension_numbers<[1], [0], [0], [1], [0, 0, 1, 1], [], []>} : vector<16x16xbf16>, vector<16x32xbf16>, vector<16x32xf32> -> vector<16x32xf32>
    %c0_3 = arith.constant 0 : index
    %c0_4 = arith.constant 0 : index
    %3 = vector.load %arg4[%c0_3, %c0_4] : memref<1x32xf32, #tpu.memory_space<vmem>>, vector<1x32xf32>
    %4 = vector.broadcast %3 : vector<1x32xf32> to vector<16x32xf32>
    %5 = arith.addf %2, %4 : vector<16x32xf32>
    %cst_5 = arith.constant 0.000000e+00 : f32
    %6 = vector.broadcast %cst_5 : f32 to vector<16x32xf32>
    %7 = arith.maximumf %5, %6 : vector<16x32xf32>
    %8 = math.absf %5 : vector<16x32xf32>
    %cst_6 = arith.constant 0.000000e+00 : f32
    %9 = vector.broadcast %cst_6 : f32 to vector<16x32xf32>
    %10 = arith.subf %9, %8 : vector<16x32xf32>
    %11 = math.exp %10 : vector<16x32xf32>
    %12 = math.log1p %11 : vector<16x32xf32>
    %13 = arith.addf %7, %12 : vector<16x32xf32>
    %14 = arith.truncf %13 : vector<16x32xf32> to vector<16x32xbf16>
    %c0_7 = arith.constant 0 : index
    %c0_8 = arith.constant 0 : index
    %15 = vector.load %arg5[%c0_7, %c0_8] : memref<32x32xbf16, #tpu.memory_space<vmem>>, vector<32x32xbf16>
    %cst_9 = arith.constant dense<0.000000e+00> : vector<16x32xf32>
    %16 = tpu.matmul %14, %15, %cst_9 {dimension_numbers = #tpu.dot_dimension_numbers<[1], [0], [0], [1], [0, 0, 1, 1], [], []>} : vector<16x32xbf16>, vector<32x32xbf16>, vector<16x32xf32> -> vector<16x32xf32>
    %c0_10 = arith.constant 0 : index
    %c0_11 = arith.constant 0 : index
    %17 = vector.load %arg6[%c0_10, %c0_11] : memref<1x32xf32, #tpu.memory_space<vmem>>, vector<1x32xf32>
    %18 = vector.broadcast %17 : vector<1x32xf32> to vector<16x32xf32>
    %19 = arith.addf %16, %18 : vector<16x32xf32>
    %c0_12 = arith.constant 0 : index
    %c0_13 = arith.constant 0 : index
    %20 = vector.load %arg2[%c0_12, %c0_13] : memref<16x32xbf16, #tpu.memory_space<vmem>>, vector<16x32xbf16>
    %21 = arith.extf %20 : vector<16x32xbf16> to vector<16x32xf32>
    %22 = arith.addf %21, %19 : vector<16x32xf32>
    %c0_14 = arith.constant 0 : index
    %c0_15 = arith.constant 0 : index
    %23 = vector.load %arg7[%c0_14, %c0_15] : memref<16x32xf32, #tpu.memory_space<vmem>>, vector<16x32xf32>
    tpu.vector_store %arg7[%c0_14, %c0_15], %22 {strides = array<i32>} : memref<16x32xf32, #tpu.memory_space<vmem>>, vector<16x32xf32>,
    return
  }
  func.func @transform_0(%arg0: i32) -> (i32, i32) {
    %c0_i32 = arith.constant 0 : i32
    %c0_i32_0 = arith.constant 0 : i32
    return %arg0, %c0_i32 : i32, i32
  }
  func.func @transform_1(%arg0: i32) -> (i32, i32) {
    %c0_i32 = arith.constant 0 : i32
    %c0_i32_0 = arith.constant 0 : i32
    return %arg0, %c0_i32 : i32, i32
  }
  func.func @transform_2(%arg0: i32) -> (i32, i32) {
    %c0_i32 = arith.constant 0 : i32
    %c0_i32_0 = arith.constant 0 : i32
    %c0_i32_1 = arith.constant 0 : i32
    return %c0_i32, %c0_i32_0 : i32, i32
  }
  func.func @transform_3(%arg0: i32) -> (i32, i32) {
    %c0_i32 = arith.constant 0 : i32
    %c0_i32_0 = arith.constant 0 : i32
    %c0_i32_1 = arith.constant 0 : i32
    return %c0_i32, %c0_i32_0 : i32, i32
  }
  func.func @transform_4(%arg0: i32) -> (i32, i32) {
    %c0_i32 = arith.constant 0 : i32
    %c0_i32_0 = arith.constant 0 : i32
    %c0_i32_1 = arith.constant 0 : i32
    return %c0_i32, %c0_i32_0 : i32, i32
  }
  func.func @transform_5(%arg0: i32) -> (i32, i32) {
    %c0_i32 = arith.constant 0 : i32
    %c0_i32_0 = arith.constant 0 : i32
    %c0_i32_1 = arith.constant 0 : i32
    return %c0_i32, %c0_i32_0 : i32, i32
  }
  func.func @transform_6(%arg0: i32) -> (i32, i32) {
    %c0_i32 = arith.constant 0 : i32
    %c0_i32_0 = arith.constant 0 : i32
    return %arg0, %c0_i32 : i32, i32
  }
}

</mosaic_0001>

<bundles_post_ra>
// kernel: tpu_custom_call.1
= control target key start
LH: loop header
LB: loop body
LE: loop exit
PB: predicated region body
PF: predicated region fallthrough
CT: control target
= control target key end

     0   :  { %11 = vsyncpa [#allocation3], 0  ;;  %s464_s0 = inlined_call_operand.hbm [shape: bf16[16,16], index: 0, kind: input, shape index: {}]   ;;  %s465_s1 = inlined_call_operand.hbm [shape: bf16[16,32], index: 1, kind: input, shape index: {}]   ;;  %s466_s2 = inlined_call_operand.hbm [shape: bf16[16,32], index: 2, kind: input, shape index: {}]   ;;  %s467_s3 = inlined_call_operand.vmem [shape: f32[1,32], index: 3, kind: input, shape index: {}]   ;;  %s468_s4 = inlined_call_operand.hbm [shape: bf16[32,32], index: 4, kind: input, shape index: {}]   ;;  %s469_s5 = inlined_call_operand.vmem [shape: f32[1,32], index: 5, kind: input, shape index: {}]   ;;  %s470_s6 = inlined_call_operand.hbm [shape: f32[16,32], index: 6, kind: output, shape index: {}]  }
   0x1   :  { %12 = vsyncpa [#allocation6], 0 }
   0x2   :  { %13 = vsyncpa [#allocation9], 0 }
   0x3   :  { %14 = vsyncpa [#allocation4], 0  ;;  %s32_s23 = sshll.u32 %s465_s1, 4  ;;  %s396_s24 = smov [#allocation5]   ;;  %s33_s23 = int_to_ptr.hbm [resolvable:$true] %s32_s23 }
   0x4   :  { %s34_s25 = sshll.u32 %s396_s24, 4  ;;  %s19_s28 = sshll.u32 %s464_s0, 4  ;;  %s35_s25 = int_to_ptr.vmem [resolvable:$true] %s34_s25  ;;  %s20_s28 = int_to_ptr.hbm [resolvable:$true] %s19_s28 }
   0x5   :  { %s397_s29 = smov 64   ;;  %s398_s30 = smov 4  }
   0x6   :  { %40 = dma.hbm_to_vmem [thread:$0]  %s33_s23, 128, %s35_s25, [#allocation6], %s397_s29, %s397_s29, %s398_s30  }
   0x7   :  { %s399_s7 = smov [#allocation2]   ;;  %s45_s11 = sshll.u32 %s466_s2, 4  ;;  %s46_s11 = int_to_ptr.hbm [resolvable:$true] %s45_s11 }
   0x8   :  { %s21_s8 = sshll.u32 %s399_s7, 4  ;;  %s60_s13 = sshll.u32 %s468_s4, 4  ;;  %s22_s8 = int_to_ptr.vmem [resolvable:$true] %s21_s8  ;;  %s61_s13 = int_to_ptr.hbm [resolvable:$true] %s60_s13 }
   0x9   :  { %27 = dma.hbm_to_vmem [thread:$0]  %s20_s28, 128, %s22_s8, [#allocation3], %s397_s29, %s397_s29, %s398_s30  }
   0xa   :  { %s400_s14 = smov [#allocation7]   ;;  %s401_s0 = smov [#allocation8]  }
   0xb   :  { %s47_s15 = sshll.u32 %s400_s14, 4  ;;  %s62_s16 = sshll.u32 %s401_s0, 4  ;;  %s48_s15 = int_to_ptr.vmem [resolvable:$true] %s47_s15  ;;  %s63_s16 = int_to_ptr.vmem [resolvable:$true] %s62_s16 }
   0xc   :  { %53 = dma.hbm_to_vmem [thread:$0]  %s46_s11, 128, %s48_s15, [#allocation6], %s397_s29, %s397_s29, %s398_s30  }
   0xd   :  { %68 = dma.hbm_to_vmem [thread:$0]  %s61_s13, 256, %s63_s16, [#allocation9], %s397_s29, %s397_s29, %s398_s30  }
   0xe   :  { %388 = dma.done.wait [#allocation3], 128  }
   0xf   :  { %389 = vsyncadd [#allocation3], 4294967168 }
  0x10   :  { %390 = dma.done.wait [#allocation6], 256  }
  0x11   :  { %391 = vsyncadd [#allocation6], 4294967040 }
  0x12   :  { %392 = dma.done.wait [#allocation9], 256  }
  0x13   :  { %393 = vsyncadd [#allocation9], 4294967040  ;;  %v242_v0 = vld [vmem:[#allocation7] sm:$0xff]  ;;  %v241_v1 = vld [vmem:[#allocation2] sm:$0xff]  ;;  %vm107_vm0 = vcmask 130048   ;;  %vm176_vm3 = vcmask 261120  }
  0x14   :  { %118 = vmatpush.bf16.msra.mxu0 %v242_v0  ;;  %v258_v2 = vld [vmem:[%s467_s3] ss:$0 sm:$0xff]  ;;  %v243_v7 = vld [vmem:[#allocation8] sm:$0xff]  ;;  %v246_v38 = vld [vmem:[#allocation5] sm:$0xff]   ;;  %s402_s18 = smov [#allocation10]   ;;  %s208_s22 = sshll.u32 %s470_s6, 4  ;;  %s209_s22 = int_to_ptr.hbm [resolvable:$true] %s208_s22 }
  0x15   :  { %v244_v3 = vld [vmem:[#allocation8 + $0x8] sm:$0xff]  ;;  %v247_v40 = vunpack.c.l.bf16 %v246_v38  ;;  %v248_v44 = vunpack.c.h.bf16 %v246_v38  ;;  %s206_s19 = sshll.u32 %s402_s18, 4  ;;  %s404_s23 = smov 8   ;;  %s207_s19 = int_to_ptr.vmem [resolvable:$true] %s206_s19 }
  0x16   :  { %186 = vmatpush.bf16.msra.mxu1 %v244_v3  ;;  %v259_v39 = vld [vmem:[%s469_s5] ss:$0 sm:$0xff]  ;;  %s403_s5 = smov 128  }
  0x17   :  { %231 = vmatmul.msk.bf16.vlgmr.msra.gmra.mxu0 %vm107_vm0, %v241_v1 }
  0x1a   :  { %187 = vmatpush.bf16.msra.mxu1 %v243_v7 }
  0x94   :  { %v120_v4 = vpop.f32.mrf.mxu0 }
  0x95   :  { %v121_v5 = vadd.f32 %v258_v2, %v120_v4 }
  0x97   :  { %v127_v6 = vand.u32 2147483647, %v121_v5  ;;  %v125_v32 = vmax.f32 %v121_v5, 0.0 }
  0x99   :  { %v129_v8 = vsub.f32 0.0, %v127_v6 }
  0x9b   :  { %v131_v9 = vmul.f32 1.442695, %v129_v8 }
  0x9c   :  { %v122_v10 = vpop.f32.mrf.mxu0 }
  0x9d   :  { %260 = vpow2.f32 %v131_v9  ;;  %v123_v11 = vadd.f32 %v258_v2, %v122_v10 }
  0x9f   :  { %v128_v12 = vand.u32 2147483647, %v123_v11  ;;  %v126_v33 = vmax.f32 %v123_v11, 0.0 }
  0xa1   :  { %v130_v13 = vsub.f32 0.0, %v128_v12 }
  0xa3   :  { %v261_v14 = vpop.eup %260  ;;  %v133_v15 = vmul.f32 1.442695, %v130_v13 }
  0xa4   :  { %v135_v16 = vadd.f32 1.0, %v261_v14  ;;  %v138_v18 = vmul.f32 -0.5, %v261_v14  ;;  %v141_v23 = vand.u32 2147483647, %v261_v14 }
  0xa5   :  { %262 = vpow2.f32 %v133_v15 }
  0xa6   :  { %264 = vlog2.f32 %v135_v16  ;;  %v139_v22 = vadd.f32 1.0, %v138_v18  ;;  %vm142_vm1 = vcmp.lt.f32.partialorder %v141_v23, 0.0004427343 }
  0xa8   :  { %v140_v27 = vmul.f32 %v261_v14, %v139_v22 }
  0xab   :  { %v263_v17 = vpop.eup %262 }
  0xac   :  { %v144_v19 = vadd.f32 1.0, %v263_v17  ;;  %v147_v20 = vmul.f32 -0.5, %v263_v17  ;;  %v265_v21 = vpop.eup %264  ;;  %v150_v26 = vand.u32 2147483647, %v263_v17 }
  0xad   :  { %v137_v24 = vmul.f32 0.6931472, %v265_v21 }
  0xae   :  { %266 = vlog2.f32 %v144_v19  ;;  %v148_v25 = vadd.f32 1.0, %v147_v20  ;;  %vm151_vm2 = vcmp.lt.f32.partialorder %v150_v26, 0.0004427343 }
  0xaf   :  { %v143_v29 = vsel %vm142_vm1, %v140_v27, %v137_v24 }
  0xb0   :  { %v149_v31 = vmul.f32 %v263_v17, %v148_v25  ;;  %v153_v35 = vadd.f32 %v143_v29, %v125_v32 }
  0xb4   :  { %v267_v28 = vpop.eup %266 }
  0xb5   :  { %v146_v30 = vmul.f32 0.6931472, %v267_v28 }
  0xb7   :  { %v152_v34 = vsel %vm151_vm2, %v149_v31, %v146_v30 }
  0xb8   :  { %v154_v36 = vadd.f32 %v152_v34, %v126_v33 }
  0xba   :  { %v155_v37 = vpack.c.bf16 %v154_v36, %v153_v35 }
  0xbc   :  { %240 = vmatmul.msk.bf16.vlgmr.msra.gmra.mxu1 %vm176_vm3, %v155_v37 }
 0x139   :  { %v189_v41 = vpop.f32.mrf.mxu1 }
 0x13a   :  { %v190_v42 = vadd.f32 %v259_v39, %v189_v41 }
 0x13c   :  { %v198_v43 = vadd.f32 %v247_v40, %v190_v42 }
 0x13e   :  { %200 = vst.msk [vmem:[#allocation10] sm:$0xff] %vm176_vm3, %v198_v43 }
 0x141   :  { %v191_v45 = vpop.f32.mrf.mxu1 }
 0x142   :  { %v192_v46 = vadd.f32 %v259_v39, %v191_v45 }
 0x144   :  { %v199_v47 = vadd.f32 %v248_v44, %v192_v46 }
 0x146   :  { %201 = vst.msk [vmem:[#allocation10 + $0x8] sm:$0xff] %vm176_vm3, %v199_v47 }
 0x147   :  { %214 = dma.vmem_to_hbm [thread:$0]  %s207_s19, 256, %s209_s22, [#allocation4], %s403_s5, %s403_s5, %s404_s23  }
 0x148   :  { %394 = dma.done.wait [#allocation4], 256  }
 0x149   :  { %395 = vsyncadd [#allocation4], 4294967040 }
 0x14a   :  { %219 = vsyncpa [#allocation3], 1 }
 0x14b   :  { %220 = vsyncpa [#allocation6], 1 }
 0x14c   :  { %221 = vsyncpa [#allocation9], 1 }
 0x14d   :  { %222 = vsyncpa [#allocation4], 1 }

</bundles_post_ra>
